<compile_context>
chip_gen: v7x
topology: tpu7x:2x2x1
jax: 0.10.0
libtpu: 0.0.40
codegen_flags: <defaults>
</compile_context>

<pallas_src>
import jax
import jax.numpy as jnp
from jax import lax
from jax.experimental import pallas as pl
from jax.experimental.pallas import tpu as pltpu


# ----------------------------- Pallas kernels ------------------------------


def _conv_stage_kernel(xc_ref, w3_ref, scale_ref, shift_ref, w1_ref, b1_ref,
                       z_ref):
    """conv3x3 (one K=9*Cin matmul) + BN(eval) + ReLU + conv1x1(+bias).

    Everything is channel-major (channels on sublanes, flattened spatial on
    lanes) so matmuls/stores are lane-dense and no transposes are needed.

    xc_ref    : (1, 9*Cin, S)   im2col'd input row band, S = band_h * W
    w3_ref    : (Cmid, 9*Cin)   3x3 weights, taps folded into K
    scale_ref : (Cmid, 1) f32   BN scale
    shift_ref : (Cmid, 1) f32   BN shift
    w1_ref    : (Cout, Cmid)    1x1 weights
    b1_ref    : (Cout, 1) f32   1x1 bias
    z_ref     : (1, Cout, S)    output band
    """
    acc = jnp.dot(w3_ref[...], xc_ref[0],
                  preferred_element_type=jnp.float32)             # (Cmid, S)
    fm = jnp.maximum(acc * scale_ref[...] + shift_ref[...], 0.0)  # BN + ReLU
    z = jnp.dot(w1_ref[...], fm.astype(w1_ref.dtype),
                preferred_element_type=jnp.float32) + b1_ref[...]  # (Cout, S)
    z_ref[0] = z.astype(z_ref.dtype)


def _upsample_kernel(z_ref, awt_ref, ah_ref, out_ref, yw_ref):
    """Separable bilinear upsample (align_corners=True) for one (n, c).

    z_ref   : (1, 1, H, W)       conv output, sample n / channel c
    awt_ref : (W, Wout)          W-direction interp matrix (transposed)
    ah_ref  : (band, H)          H-direction interp rows for this output band
    out_ref : (1, 1, band, Wout)
    yw_ref  : (H, Wout) f32      persistent scratch: W-interp result, computed
                                 once per (n, c) on band 0 and reused.
    """
    @pl.when(pl.program_id(2) == 0)
    def _():
        yw_ref[...] = jnp.dot(z_ref[0, 0], awt_ref[...],
                              preferred_element_type=jnp.float32)

    out_ref[0, 0] = jnp.dot(ah_ref[...], yw_ref[...].astype(ah_ref.dtype),
                            preferred_element_type=jnp.float32
                            ).astype(out_ref.dtype)


# ------------------------------- glue code ---------------------------------


def _interp_matrix(out_size, in_size):
    """Dense 1-D bilinear interpolation matrix, align_corners=True."""
    o = jnp.arange(out_size, dtype=jnp.float32)
    if out_size == 1:
        src = jnp.zeros((1,), jnp.float32)
    else:
        src = o * (in_size - 1) / (out_size - 1)
    i0 = jnp.clip(jnp.floor(src).astype(jnp.int32), 0, max(in_size - 2, 0))
    i1 = jnp.minimum(i0 + 1, in_size - 1)
    frac = src - i0.astype(jnp.float32)
    rows = jnp.arange(out_size)
    A = jnp.zeros((out_size, in_size), jnp.float32)
    A = A.at[rows, i0].add(1.0 - frac)
    A = A.at[rows, i1].add(frac)
    return A


def _pick_conv_band(H, W, row_bytes):
    """Largest divisor t of H with (t*W) % 128 == 0 under a ~2 MiB band."""
    best = None
    for t in range(1, H + 1):
        if H % t == 0 and (t * W) % 128 == 0 and t * row_bytes <= (2 << 20):
            best = t
    return best if best is not None else H


def _pick_out_band(Hout, Wout, elem_bytes):
    """Largest divisor t of Hout, multiple of 8, under ~1 MiB output band."""
    best = None
    for t in range(1, Hout + 1):
        if Hout % t == 0 and t % 8 == 0 and t * Wout * elem_bytes <= (1 << 20):
            best = t
    return best if best is not None else Hout


def fpnet_head_forward(x_nchw, params, scale, image_hw,
                       compute_dtype=jnp.bfloat16, out_dtype=jnp.float32,
                       conv_band=None, out_band=None):
    N, Cin, H, W = x_nchw.shape
    w3 = params["w3"]                                   # (3,3,Cin,Cmid) HWIO
    Cmid = w3.shape[-1]
    w1 = params["w1"]                                   # (Cmid, Cout)
    Cout = w1.shape[-1]

    eps = 1e-5
    bn_scale = (params["gamma"] /
                jnp.sqrt(params["running_var"] + eps)).reshape(Cmid, 1)
    bn_shift = (params["beta"] -
                params["running_mean"] * bn_scale[:, 0]).reshape(Cmid, 1)
    bn_scale = bn_scale.astype(jnp.float32)
    bn_shift = bn_shift.astype(jnp.float32)

    # channel-major weights; 3x3 taps folded into the contraction dim.
    w3t = w3.reshape(9 * Cin, Cmid).T.astype(compute_dtype)   # (Cmid, 9*Cin)
    w1t = w1.T.astype(compute_dtype)                          # (Cout, Cmid)
    b1 = params["b1"].reshape(Cout, 1).astype(jnp.float32)

    # Channel-major im2col (N, 9*Cin, H*W), tap order (kh, kw, cin) matching
    # w3t.  The 3x3 halo is baked in, so input-row bands are independent.
    xp = jnp.pad(x_nchw, ((0, 0), (0, 0), (1, 1), (1, 1)))
    cols = [xp[:, :, kh:kh + H, kw:kw + W]
            for kh in range(3) for kw in range(3)]
    xcol = jnp.concatenate(cols, axis=1).reshape(N, 9 * Cin, H * W)
    xcol = xcol.astype(compute_dtype)

    # ---- kernel A: conv3x3 + BN + ReLU + conv1x1, banded over input rows ---
    elem = jnp.dtype(compute_dtype).itemsize
    if conv_band is None:
        conv_band = _pick_conv_band(H, W, 9 * Cin * W * elem)
    assert H % conv_band == 0
    assert conv_band == H or (conv_band * W) % 128 == 0
    nhb = H // conv_band
    S = conv_band * W

    z = pl.pallas_call(
        _conv_stage_kernel,
        out_shape=jax.ShapeDtypeStruct((N, Cout, H * W), compute_dtype),
        grid_spec=pltpu.PrefetchScalarGridSpec(
            num_scalar_prefetch=0,
            grid=(N, nhb),
            in_specs=[
                pl.BlockSpec((1, 9 * Cin, S), lambda n, h: (n, 0, h)),
                pl.BlockSpec((Cmid, 9 * Cin), lambda n, h: (0, 0)),
                pl.BlockSpec((Cmid, 1), lambda n, h: (0, 0)),
                pl.BlockSpec((Cmid, 1), lambda n, h: (0, 0)),
                pl.BlockSpec((Cout, Cmid), lambda n, h: (0, 0)),
                pl.BlockSpec((Cout, 1), lambda n, h: (0, 0)),
            ],
            out_specs=pl.BlockSpec((1, Cout, S), lambda n, h: (n, 0, h)),
        ),
        compiler_params=pltpu.CompilerParams(
            dimension_semantics=("parallel", "parallel"),
            vmem_limit_bytes=48 * 1024 * 1024),
    )(xcol, w3t, bn_scale, bn_shift, w1t, b1)

    if scale <= 1:
        return z.reshape(N, Cout, H, W).astype(out_dtype)

    # ---- kernel B: separable bilinear upsample, banded over output rows ----
    Hout, Wout = image_hw
    ah = _interp_matrix(Hout, H).astype(compute_dtype)        # (Hout, H)
    awt = _interp_matrix(Wout, W).T.astype(compute_dtype)     # (W, Wout)
    z4 = z.reshape(N, Cout, H, W)                             # free XLA reshape

    if out_band is None:
        out_band = _pick_out_band(Hout, Wout, jnp.dtype(out_dtype).itemsize)
    assert Hout % out_band == 0
    assert out_band % 8 == 0 or out_band == Hout
    nob = Hout // out_band

    out = pl.pallas_call(
        _upsample_kernel,
        out_shape=jax.ShapeDtypeStruct((N, Cout, Hout, Wout), out_dtype),
        grid_spec=pltpu.PrefetchScalarGridSpec(
            num_scalar_prefetch=0,
            grid=(N, Cout, nob),
            in_specs=[
                pl.BlockSpec((1, 1, H, W), lambda n, c, b: (n, c, 0, 0)),
                pl.BlockSpec((W, Wout), lambda n, c, b: (0, 0)),
                pl.BlockSpec((out_band, H), lambda n, c, b: (b, 0)),
            ],
            out_specs=pl.BlockSpec((1, 1, out_band, Wout),
                                   lambda n, c, b: (n, c, b, 0)),
            scratch_shapes=[pltpu.VMEM((H, Wout), jnp.float32)],
        ),
        compiler_params=pltpu.CompilerParams(
            dimension_semantics=("parallel", "parallel", "arbitrary"),
            vmem_limit_bytes=48 * 1024 * 1024),
    )(z4, awt, ah)
    return out


def fpnet_head_reference(x_nchw, params, scale, image_hw):
    """Pure-JAX reference (XLA conv + einsum interp), for correctness check."""
    x = jnp.transpose(x_nchw, (0, 2, 3, 1))
    fm = lax.conv_general_dilated(
        x, params["w3"], window_strides=(1, 1), padding=((1, 1), (1, 1)),
        dimension_numbers=("NHWC", "HWIO", "NHWC"))
    eps = 1e-5
    fm = (fm - params["running_mean"]) / jnp.sqrt(params["running_var"] + eps)
    fm = fm * params["gamma"] + params["beta"]
    fm = jnp.maximum(fm, 0.0)
    out = jnp.einsum("nhwc,co->nhwo", fm, params["w1"]) + params["b1"]
    if scale > 1:
        Hout, Wout = image_hw
        ah = _interp_matrix(Hout, x.shape[1])
        aw = _interp_matrix(Wout, x.shape[2])
        out = jnp.einsum("Oh,Pw,nhwc->nOPc", ah, aw, out)
    return jnp.transpose(out, (0, 3, 1, 2))


# --------------------------------- main ------------------------------------

if __name__ == "__main__":
    # Config consistent with FPNetHead(is_aux=False, alpha=1):
    #   Cmid = round(64 * alpha) = 64, conv1x1 -> out_planes, scale = 2.
    N, Cin, H, W = 2, 4, 16, 16
    Cmid, Cout = 64, 8
    scale = 2
    image_hw = (H * scale, W * scale)   # stands in for config.image_{height,width}

    key = jax.random.PRNGKey(0)
    k = jax.random.split(key, 7)
    params = {
        "w3": jax.random.normal(k[0], (3, 3, Cin, Cmid), jnp.float32) * 0.1,
        "gamma": jax.random.uniform(k[1], (Cmid,), jnp.float32, 0.5, 1.5),
        "beta": jax.random.normal(k[2], (Cmid,), jnp.float32) * 0.1,
        "running_mean": jax.random.normal(k[3], (Cmid,), jnp.float32) * 0.1,
        "running_var": jax.random.uniform(k[4], (Cmid,), jnp.float32, 0.5, 1.5),
        "w1": jax.random.normal(k[5], (Cmid, Cout), jnp.float32) * 0.1,
        "b1": jax.random.normal(k[6], (Cout,), jnp.float32) * 0.1,
    }
    x = jax.random.normal(jax.random.PRNGKey(1), (N, Cin, H, W), jnp.float32)

    ref = jax.block_until_ready(fpnet_head_reference(x, params, scale, image_hw))

    # f32 matmul-input path (tight tolerance); banding exercised explicitly
    # (conv_band=8 -> 2 input-row bands, out_band=8 -> 4 output-row bands).
    out_f32 = jax.block_until_ready(
        fpnet_head_forward(x, params, scale, image_hw,
                           compute_dtype=jnp.float32, out_dtype=jnp.float32,
                           conv_band=8, out_band=8))
    assert out_f32.shape == (N, Cout, image_hw[0], image_hw[1]), out_f32.shape
    assert jnp.allclose(out_f32, ref, rtol=2e-4, atol=2e-4), (
        float(jnp.max(jnp.abs(out_f32 - ref))))

    # default path: bf16 MXU inputs (f32 accumulation), bf16 output.
    out_bf16 = jax.block_until_ready(
        fpnet_head_forward(x, params, scale, image_hw,
                           out_dtype=jnp.bfloat16, conv_band=8, out_band=8))
    assert out_bf16.dtype == jnp.bfloat16
    assert jnp.allclose(out_bf16.astype(jnp.float32), ref,
                        rtol=5e-2, atol=5e-2), (
        float(jnp.max(jnp.abs(out_bf16.astype(jnp.float32) - ref))))

    # scale=1 path (no upsample), automatic band selection.
    ref1 = jax.block_until_ready(fpnet_head_reference(x, params, 1, image_hw))
    out1 = jax.block_until_ready(
        fpnet_head_forward(x, params, 1, image_hw,
                           compute_dtype=jnp.float32))
    assert out1.shape == (N, Cout, H, W), out1.shape
    assert jnp.allclose(out1, ref1, rtol=2e-4, atol=2e-4), (
        float(jnp.max(jnp.abs(out1 - ref1))))

    print("KERNEL_OK")
</pallas_src>

<mosaic_0001>
module attributes {stable_mosaic.version = 11 : i64} {
  func.func @_conv_stage_kernel(%arg0: i32, %arg1: i32, %arg2: memref<1x36x128xf32, #tpu.memory_space<vmem>>, %arg3: memref<64x36xf32, #tpu.memory_space<vmem>>, %arg4: memref<64x1xf32, #tpu.memory_space<vmem>>, %arg5: memref<64x1xf32, #tpu.memory_space<vmem>>, %arg6: memref<8x64xf32, #tpu.memory_space<vmem>>, %arg7: memref<8x1xf32, #tpu.memory_space<vmem>>, %arg8: memref<1x8x128xf32, #tpu.memory_space<vmem>>) attributes {dimension_semantics = [#tpu.dimension_semantics<parallel>, #tpu.dimension_semantics<parallel>], iteration_bounds = array<i64: 2, 2>, scalar_prefetch = 0 : i64, scratch_operands = 0 : i64, tpu.core_type = #tpu.core_type<tc>, window_params = [{transform_indices = @transform_0, window_bounds = array<i64: 1, 36, 128>}, {pipeline_mode = #tpu.pipeline_mode<synchronous>, transform_indices = @transform_1, window_bounds = array<i64: 64, 36>}, {pipeline_mode = #tpu.pipeline_mode<synchronous>, transform_indices = @transform_2, window_bounds = array<i64: 64, 1>}, {pipeline_mode = #tpu.pipeline_mode<synchronous>, transform_indices = @transform_3, window_bounds = array<i64: 64, 1>}, {pipeline_mode = #tpu.pipeline_mode<synchronous>, transform_indices = @transform_4, window_bounds = array<i64: 8, 64>}, {pipeline_mode = #tpu.pipeline_mode<synchronous>, transform_indices = @transform_5, window_bounds = array<i64: 8, 1>}, {transform_indices = @transform_6, window_bounds = array<i64: 1, 8, 128>}]} {
    %c0 = arith.constant 0 : index
    %c0_0 = arith.constant 0 : index
    %0 = vector.load %arg3[%c0, %c0_0] : memref<64x36xf32, #tpu.memory_space<vmem>>, vector<64x36xf32>
    %c0_1 = arith.constant 0 : index
    %c0_2 = arith.constant 0 : index
    %c0_3 = arith.constant 0 : index
    %1 = vector.load %arg2[%c0_1, %c0_2, %c0_3] : memref<1x36x128xf32, #tpu.memory_space<vmem>>, vector<1x36x128xf32>
    %2 = vector.shape_cast %1 : vector<1x36x128xf32> to vector<36x128xf32>
    %cst = arith.constant dense<0.000000e+00> : vector<64x128xf32>
    %3 = tpu.matmul %0, %2, %cst {dimension_numbers = #tpu.dot_dimension_numbers<[1], [0], [0], [1], [0, 0, 1, 1], [], []>} : vector<64x36xf32>, vector<36x128xf32>, vector<64x128xf32> -> vector<64x128xf32>
    %c0_4 = arith.constant 0 : index
    %c0_5 = arith.constant 0 : index
    %4 = vector.load %arg4[%c0_4, %c0_5] : memref<64x1xf32, #tpu.memory_space<vmem>>, vector<64x1xf32>
    %5 = vector.broadcast %4 : vector<64x1xf32> to vector<64x128xf32>
    %6 = arith.mulf %3, %5 : vector<64x128xf32>
    %c0_6 = arith.constant 0 : index
    %c0_7 = arith.constant 0 : index
    %7 = vector.load %arg5[%c0_6, %c0_7] : memref<64x1xf32, #tpu.memory_space<vmem>>, vector<64x1xf32>
    %8 = vector.broadcast %7 : vector<64x1xf32> to vector<64x128xf32>
    %9 = arith.addf %6, %8 : vector<64x128xf32>
    %cst_8 = arith.constant 0.000000e+00 : f32
    %10 = vector.broadcast %cst_8 : f32 to vector<64x128xf32>
    %11 = arith.maximumf %9, %10 : vector<64x128xf32>
    %c0_9 = arith.constant 0 : index
    %c0_10 = arith.constant 0 : index
    %12 = vector.load %arg6[%c0_9, %c0_10] : memref<8x64xf32, #tpu.memory_space<vmem>>, vector<8x64xf32>
    %cst_11 = arith.constant dense<0.000000e+00> : vector<8x128xf32>
    %13 = tpu.matmul %12, %11, %cst_11 {dimension_numbers = #tpu.dot_dimension_numbers<[1], [0], [0], [1], [0, 0, 1, 1], [], []>} : vector<8x64xf32>, vector<64x128xf32>, vector<8x128xf32> -> vector<8x128xf32>
    %c0_12 = arith.constant 0 : index
    %c0_13 = arith.constant 0 : index
    %14 = vector.load %arg7[%c0_12, %c0_13] : memref<8x1xf32, #tpu.memory_space<vmem>>, vector<8x1xf32>
    %15 = vector.broadcast %14 : vector<8x1xf32> to vector<8x128xf32>
    %16 = arith.addf %13, %15 : vector<8x128xf32>
    %c0_14 = arith.constant 0 : index
    %c0_15 = arith.constant 0 : index
    %c0_16 = arith.constant 0 : index
    %17 = vector.load %arg8[%c0_14, %c0_15, %c0_16] : memref<1x8x128xf32, #tpu.memory_space<vmem>>, vector<1x8x128xf32>
    %18 = vector.shape_cast %17 : vector<1x8x128xf32> to vector<8x128xf32>
    %19 = vector.shape_cast %16 : vector<8x128xf32> to vector<1x8x128xf32>
    tpu.vector_store %arg8[%c0_14, %c0_15, %c0_16], %19 {strides = array<i32>} : memref<1x8x128xf32, #tpu.memory_space<vmem>>, vector<1x8x128xf32>,
    return
  }
  func.func @transform_0(%arg0: i32, %arg1: i32) -> (i32, i32, i32) {
    %c0_i32 = arith.constant 0 : i32
    %c0_i32_0 = arith.constant 0 : i32
    return %arg0, %c0_i32, %arg1 : i32, i32, i32
  }
  func.func @transform_1(%arg0: i32, %arg1: i32) -> (i32, i32) {
    %c0_i32 = arith.constant 0 : i32
    %c0_i32_0 = arith.constant 0 : i32
    %c0_i32_1 = arith.constant 0 : i32
    return %c0_i32, %c0_i32_0 : i32, i32
  }
  func.func @transform_2(%arg0: i32, %arg1: i32) -> (i32, i32) {
    %c0_i32 = arith.constant 0 : i32
    %c0_i32_0 = arith.constant 0 : i32
    %c0_i32_1 = arith.constant 0 : i32
    return %c0_i32, %c0_i32_0 : i32, i32
  }
  func.func @transform_3(%arg0: i32, %arg1: i32) -> (i32, i32) {
    %c0_i32 = arith.constant 0 : i32
    %c0_i32_0 = arith.constant 0 : i32
    %c0_i32_1 = arith.constant 0 : i32
    return %c0_i32, %c0_i32_0 : i32, i32
  }
  func.func @transform_4(%arg0: i32, %arg1: i32) -> (i32, i32) {
    %c0_i32 = arith.constant 0 : i32
    %c0_i32_0 = arith.constant 0 : i32
    %c0_i32_1 = arith.constant 0 : i32
    return %c0_i32, %c0_i32_0 : i32, i32
  }
  func.func @transform_5(%arg0: i32, %arg1: i32) -> (i32, i32) {
    %c0_i32 = arith.constant 0 : i32
    %c0_i32_0 = arith.constant 0 : i32
    %c0_i32_1 = arith.constant 0 : i32
    return %c0_i32, %c0_i32_0 : i32, i32
  }
  func.func @transform_6(%arg0: i32, %arg1: i32) -> (i32, i32, i32) {
    %c0_i32 = arith.constant 0 : i32
    %c0_i32_0 = arith.constant 0 : i32
    return %arg0, %c0_i32, %arg1 : i32, i32, i32
  }
}

</mosaic_0001>

<bundles_post_ra>
// kernel: tpu_custom_call.1
= control target key start
LH: loop header
LB: loop body
LE: loop exit
PB: predicated region body
PF: predicated region fallthrough
CT: control target
= control target key end

     0   :  { %s1319_s0 = inlined_call_operand.vmem [shape: f32[2,36,256], index: 0, kind: input, shape index: {}]   ;;  %s1320_s1 = inlined_call_operand.vmem [shape: f32[64,36], index: 1, kind: input, shape index: {}]   ;;  %s1321_s2 = inlined_call_operand.vmem [shape: f32[64,1], index: 2, kind: input, shape index: {}]   ;;  %s1322_s3 = inlined_call_operand.vmem [shape: f32[64,1], index: 3, kind: input, shape index: {}]   ;;  %s1323_s4 = inlined_call_operand.vmem [shape: f32[8,64], index: 4, kind: input, shape index: {}]   ;;  %s1324_s5 = inlined_call_operand.vmem [shape: f32[8,1], index: 5, kind: input, shape index: {}]   ;;  %s1325_s6 = inlined_call_operand.hbm [shape: f32[2,8,256], index: 6, kind: output, shape index: {}]  }
   0x1   :  { %1326 = sst [smem:[#allocation6_spill]] %s1319_s0 }
   0x2   :  { %11 = vsyncpa [#allocation4], 0 }
   0x3   :  { %13 = vsyncpa [#allocation4 + $0x1], 0  ;;  %s1084_s21 = smov 0   ;;  %s1086_s22 = smov 0  }
   0x4   :  { %s1088_s23 = smov 0   ;;  %s1090_s24 = smov 0  }
   0x5   :  { %s1092_s25 = smov 0   ;;  %s1094_s26 = smov 0  }
   0x6   :  { %s1096_s27 = smov 0   ;;  %s1098_s28 = smov 0  }
   0x7 LB: > { %s763_s29 = sadd.s32 4294967295, %s1042_s28   ;;  %s764_s30 = sadd.s32 4294967294, %s1042_s28   ;;  %s1042_s28 = sphi %s1098_s28, %s19_s28   ;;  %s1038_s27 = sphi %s1096_s27, %s1337_s27   ;;  %s1034_s26 = sphi %s1094_s26, %s1336_s26   ;;  %s1030_s25 = sphi %s1092_s25, %s1335_s25   ;;  %s1026_s24 = sphi %s1090_s24, %s1334_s24   ;;  %s1022_s23 = sphi %s1088_s23, %s1333_s23   ;;  %s1018_s22 = sphi %s1086_s22, %s1332_s22   ;;  %s1014_s21 = sphi %s1084_s21, %s1331_s21  }
   0x8   : > { %s28_s7 = sadd.s32 1, %s1034_s26  ;;  %s31_s8 = sadd.s32 1, %s1038_s27 }
   0x9   : > { %p29_p0 = scmp.ge.s32.totalorder %s28_s7, 2  ;;  %p47_p1 = scmp.ne.s32.totalorder %s1022_s23, %s1018_s22 }
   0xa   : > { %p48_p2 = scmp.eq.s32.totalorder %s1042_s28, 0  ;;  %p184_p5 = scmp.eq.s32.totalorder %s763_s29, 3 }
   0xb   : > { %s1339_s7 = smov (%p29_p0, %s28_s7), 0  ;;  %s1341_s8 = smov (!%p29_p0, %s31_s8), %s1038_s27 }
   0xc   : > { %s36_s9 = ssub.s32 %s1034_s26, %s1339_s7  ;;  %p1136_p3 = por %p48_p2, %p47_p1 }
   0xd   : > { %p33_p4 = scmp.ge.s32.totalorder %s1341_s8, 2  ;;  %p189_p6 = scmp.ne.s32.totalorder %s1018_s22, %s1014_s21 }
   0xe   : > { %p190_p7 = scmp.eq.s32.totalorder %s764_s30, 3  ;;  %p1144_p8 = por %p184_p5, %p47_p1 }
   0xf   : > { %s1343_s8 = smov (%p33_p4, %s1341_s8), 0  ;;  %s40_s15 = sadd.s32 1, %s1022_s23 }
  0x10   : > { %p1148_p9 = por %p190_p7, %p189_p6  ;;  %s35_s13 = ssub.s32 %s1038_s27, %s1343_s8 }
  0x11   : > { %s37_s14 = sor.u32 %s36_s9, %s35_s13  ;;  %p766_p11 = scmp.ge.s32.totalorder %s1042_s28, 4 }
  0x12   : > { %p38_p10 = scmp.eq.s32.totalorder %s37_s14, 0 }
  0x13   : > { %221 = sbr.rel (%p766_p11) target bundleno = 38 (0x26), region = 36 }
  0x14   : > { %s1156_s16 = scalar_select %p38_p10, %s1022_s23, %s40_s15  }
  0x1a   : > { %224 = sbr.rel (!%p1136_p3) target bundleno = 38 (0x26), region = 40  ;;  %s226_s17 = sand.u32 (%p1136_p3), 1, %s1022_s23  }
  0x1b   : > { %s869_s18 = smul.u32 (%p1136_p3), 10, %s1038_s27  ;;  %s1330_s0 = sld [smem:[#allocation6_spill]] (%p1136_p3) }
  0x1c   : > { %s868_s19 = smul.u32 (%p1136_p3), 40, %s226_s17 }
  0x1d   : > { %s230_s20 = sadd.s32 (%p1136_p3), %s1034_s26, %s869_s18 }
  0x1e   : > { %s767_s29 = sshll.u32 (%p1136_p3), %s230_s20, 3  ;;  %s228_s14 = scalar_lea.vmem (%p1136_p3), [#allocation2], %s868_s19 }
  0x21   : > { %s232_s13 = scalar_lea.vmem %s1330_s0, %s767_s29 }
  0x22   : > { %v268_v0 = vld [vmem:[%s232_s13] sm:$0xff]  ;;  %v270_v1 = vld [vmem:[%s232_s13 + $0x10] sm:$0xff] }
  0x23   : > { %v272_v2 = vld [vmem:[%s232_s13 + $0x20] sm:$0xff]  ;;  %269 = vst [vmem:[%s228_s14] sm:$0xff] %v268_v0  ;;  %271 = vst [vmem:[%s228_s14 + $0x8] sm:$0xff] %v270_v1  ;;  %v274_v3 = vld [vmem:[%s232_s13 + $0x30] sm:$0xff] }
  0x24   : > { %273 = vst [vmem:[%s228_s14 + $0x10] sm:$0xff] %v272_v2  ;;  %v276_v4 = vld [vmem:[%s232_s13 + $0x40] sm:$0xff]  ;;  %275 = vst [vmem:[%s228_s14 + $0x18] sm:$0xff] %v274_v3 }
  0x25   : > { %277 = vst [vmem:[%s228_s14 + $0x20] sm:$0xff] %v276_v4 }
  0x26 PF: > { %p768_p12 = scmp.ge.s32.totalorder %s1042_s28, 1  ;;  %p282_p13 = scmp.lt.s32.totalorder %s1042_s28, 5 }
  0x28   : > { %p283_p0 = pnand %p768_p12, %p282_p13 }
  0x29   : > { %s1170_s10 = sand.u32 (!%p283_p0), 1, %s1018_s22   ;;  %v318_v5 = vld [vmem:[%s1320_s1] sm:$0xff] (!%p283_p0)  ;;  %vm331_vm0 = vcmask (!%p283_p0), 293888   ;;  %v1044_v6 = vmov (!%p283_p0), 0   ;;  %v466_v9 = vld [vmem:[%s1321_s2 + $0x8] sm:$0xff] (!%p283_p0)  ;;  %v467_v17 = vld [vmem:[%s1321_s2 + $0x10] sm:$0xff] (!%p283_p0) }
  0x2a   : > { %286 = sbr.rel (%p283_p0) target bundleno = 523 (0x20b), region = 78  ;;  %817 = vmatprep.mubr.msk.f32.mxu0 (!%p283_p0), %vm331_vm0, %v318_v5  ;;  %946 = vset.pattern.permute.xlu0 (!%p283_p0), %v1044_v6  ;;  %v465_v7 = vld [vmem:[%s1321_s2] sm:$0xff] (!%p283_p0)  ;;  %v522_v15 = vld [vmem:[%s1322_s3 + $0x8] sm:$0xff] (!%p283_p0)  ;;  %v468_v18 = vld [vmem:[%s1321_s2 + $0x18] sm:$0xff] (!%p283_p0)  ;;  %vm356_vm1 = vcmask (!%p283_p0), 1043456   ;;  %v1045_v38 = vmov (!%p283_p0), 0.0|0.0  }
  0x2b   : > { %s870_s18 = smul.u32 (!%p283_p0), 40, %s1170_s10  ;;  %947 = vset.pattern.permute.xlu1 (!%p283_p0), %v1044_v6  ;;  %475 = vperm.xlu0 (!%p283_p0), %946, %v465_v7   ;;  %v521_v8 = vld [vmem:[%s1322_s3] sm:$0xff] (!%p283_p0)  ;;  %v523_v20 = vld [vmem:[%s1322_s3 + $0x10] sm:$0xff] (!%p283_p0)  ;;  %v524_v21 = vld [vmem:[%s1322_s3 + $0x18] sm:$0xff] (!%p283_p0)  ;;  %vm1046_vm2 = vmmov (!%p283_p0), 0   ;;  %v1047_v39 = vmov (!%p283_p0), 0.0  }
  0x2c   : > { %531 = vperm.xlu1 (!%p283_p0), %947, %v521_v8   ;;  %v319_v22 = vld [vmem:[%s1320_s1 + $0x8] sm:$0xff] (!%p283_p0)  ;;  %v320_v23 = vld [vmem:[%s1320_s1 + $0x10] sm:$0xff] (!%p283_p0)  ;;  %v469_v24 = vld [vmem:[%s1321_s2 + $0x20] sm:$0xff] (!%p283_p0)  ;;  %856 = vmatprep.subr.bf16.mxu1 (!%p283_p0), %v1045_v38  ;;  %vm592_vm3 = vcmask (!%p283_p0), 523264   ;;  %s781_s29 = sshll.u32 (!%p283_p0), %s1030_s25, 1  ;;  %s668_s25 = scalar_lea.sflag (!%p283_p0), [#allocation4], %s1170_s10 }
  0x2d   : > { %s291_s14 = scalar_lea.vmem (!%p283_p0), [#allocation2], %s870_s18  ;;  %v470_v25 = vld [vmem:[%s1321_s2 + $0x28] sm:$0xff] (!%p283_p0)  ;;  %v321_v26 = vld [vmem:[%s1320_s1 + $0x18] sm:$0xff] (!%p283_p0)  ;;  %v322_v27 = vld [vmem:[%s1320_s1 + $0x20] sm:$0xff] (!%p283_p0)  ;;  %845 = vmatprep.mubr.msk.f32.mxu1 (!%p283_p0), %vm1046_vm2, %v1047_v39  ;;  %s679_s30 = sadd.s32 (!%p283_p0), %s1026_s24, %s781_s29 }
  0x2e   : > { %v326_v10 = vld [vmem:[%s291_s14] sm:$0xff] (!%p283_p0)  ;;  %v327_v11 = vld [vmem:[%s291_s14 + $0x8] sm:$0xff] (!%p283_p0)  ;;  %v328_v12 = vld [vmem:[%s291_s14 + $0x10] sm:$0xff] (!%p283_p0)  ;;  %s782_s9 = sshll.u32 (!%p283_p0), %s679_s30, 7  ;;  %s1048_s20 = smov (!%p283_p0), [#allocation3]  }
  0x2f   : > { %v848_v13 = vpack.c.bf16 (!%p283_p0), %v327_v11, %v326_v10  ;;  %v329_v14 = vld [vmem:[%s291_s14 + $0x18] sm:$0xff] (!%p283_p0)  ;;  %480 = vperm.xlu0 (!%p283_p0), %946, %v466_v9   ;;  %v330_v19 = vld [vmem:[%s291_s14 + $0x20] sm:$0xf] (!%p283_p0)  ;;  %v324_v31 = vld [vmem:[%s1320_s1 + $0x30] sm:$0xff] (!%p283_p0)  ;;  %s769_s14 = sshll.u32 (!%p283_p0), %s1170_s10, 3  ;;  %s1265_s0 = scalar_lea.hbm (!%p283_p0), %s1325_s6, %s782_s9 }
  0x30   : > { %v852_v16 = vpack.c.bf16 (!%p283_p0), %v329_v14, %v328_v12  ;;  %536 = vperm.xlu1 (!%p283_p0), %947, %v522_v15   ;;  %v525_v28 = vld [vmem:[%s1322_s3 + $0x20] sm:$0xff] (!%p283_p0)  ;;  %v526_v29 = vld [vmem:[%s1322_s3 + $0x28] sm:$0xff] (!%p283_p0)  ;;  %v471_v32 = vld [vmem:[%s1321_s2 + $0x30] sm:$0xff] (!%p283_p0)  ;;  %s317_s13 = scalar_lea.vmem (!%p283_p0), [#allocation3], %s769_s14  ;;  %s952_s18 = sshll.u32 (!%p283_p0), %s1048_s20, 4  ;;  %s953_s18 = int_to_ptr.vmem [resolvable:$false] %s952_s18 }
  0x31   : > { %849 = vmatprep.subr.bf16.mxu0 %v848_v13  ;;  %v323_v30 = vld [vmem:[%s1320_s1 + $0x28] sm:$0xff]  ;;  %v472_v33 = vld [vmem:[%s1321_s2 + $0x38] sm:$0xff]  ;;  %v527_v35 = vld [vmem:[%s1322_s3 + $0x30] sm:$0xff]  ;;  %s683_s15 = sshll.u32 %s317_s13, 4  ;;  %s954_s14 = scalar_lea.vmem %s953_s18, 256  ;;  %s1267_s15 = int_to_ptr.vmem [resolvable:$true] %s683_s15 }
  0x32   : > { %851 = vmatpush3.bf16.msra.mxu0 %v848_v13  ;;  %v325_v34 = vld [vmem:[%s1320_s1 + $0x38] sm:$0xff]  ;;  %v586_v37 = vld [vmem:[%s1324_s5] sm:$0xff]  ;;  %s948_s24 = scalar_lea.vmem %s1267_s15, 128  ;;  %p955_p4 = scmp.lt.s32.totalorder %s1267_s15, %s953_s18 }
  0x33   : > { %853 = vmatprep.subr.bf16.mxu0 %v852_v16  ;;  %485 = vperm.xlu0 %946, %v467_v17   ;;  %v528_v36 = vld [vmem:[%s1322_s3 + $0x38] sm:$0xff]  ;;  %p949_p1 = scmp.ne.s32.totalorder %s1267_s15, %s948_s24  ;;  %p956_p5 = scmp.lt.s32.totalorder %s954_s14, %s948_s24 }
  0x34   : > { %490 = vperm.xlu1 %947, %v468_v18  }
  0x35   : > { %p950_p2 = pnand %p949_p1, %p1144_p8  ;;  %p957_p6 = por %p956_p5, %p955_p4 }
  0x36   : > { %855 = vmatpush3.bf16.msra.mxu0 %v852_v16 }
  0x37   : > { %815 = vmatprep.subr.msk.mxu0 %vm356_vm1, %v330_v19  ;;  %541 = vperm.xlu0 %946, %v523_v20   ;;  %p951_p3 = pneg %p950_p2 }
  0x38   : > { %546 = vperm.xlu1 %947, %v524_v21  }
  0x39   : > { %p958_p7 = pnand %p957_p6, %p951_p3 }
  0x3a   : > { %816 = vmatpush3.msk.msra.mxu0 %vm356_vm1, %v330_v19 }
  0x3b   : > { %818 = vmatmul.mubr.msk.f32.vlgmr.msra.gmra.mrb[0].mxu0 %vm331_vm0, %v319_v22  ;;  %495 = vperm.xlu0 %946, %v469_v24  }
  0x3c   : > { %820 = vmatprep.mubr.msk.f32.mxu0 %vm331_vm0, %v320_v23  ;;  %500 = vperm.xlu1 %947, %v470_v25  }
  0x3f   : > { %821 = vmatmul.mubr.msk.f32.gmra.mrb[2].mxu0 %vm331_vm0, %v321_v26  ;;  %551 = vperm.xlu0 %946, %v525_v28   ;;  %v585_v28 = vld [vmem:[%s1323_s4] sm:$0xff] }
  0x40   : > { %823 = vmatprep.mubr.msk.f32.mxu0 %vm331_vm0, %v322_v27  ;;  %556 = vperm.xlu1 %947, %v526_v29  }
  0x43   : > { %824 = vmatmul.mubr.msk.f32.gmra.mrb[4].mxu0 %vm331_vm0, %v323_v30  ;;  %505 = vperm.xlu0 %946, %v471_v32  }
  0x44   : > { %826 = vmatprep.mubr.msk.f32.mxu0 %vm331_vm0, %v324_v31  ;;  %510 = vperm.xlu1 %947, %v472_v33  }
  0x47   : > { %827 = vmatmul.mubr.msk.f32.gmra.mrb[6].mxu0 %vm331_vm0, %v325_v34  ;;  %561 = vperm.xlu0 %946, %v527_v35  }
  0x48   : > { %566 = vperm.xlu1 %947, %v528_v36  }
  0x4b   : > { %589 = vperm.xlu0 %946, %v586_v37  }
  0xaa   : > { %v476_v41 = vpop.permute.xlu0 %475 }
  0xab   : > { %v532_v40 = vpop.permute.xlu1 %531 }
  0xae   : > { %v481_v43 = vpop.permute.xlu0 %480 }
  0xaf   : > { %v537_v42 = vpop.permute.xlu1 %536 }
  0xb2   : > { %v486_v45 = vpop.permute.xlu0 %485 }
  0xb3   : > { %v491_v44 = vpop.permute.xlu1 %490 }
  0xb6   : > { %v542_v47 = vpop.permute.xlu0 %541 }
  0xb7   : > { %v547_v46 = vpop.permute.xlu1 %546 }
  0xba   : > { %v496_v49 = vpop.permute.xlu0 %495 }
  0xbb   : > { %v501_v48 = vpop.permute.xlu1 %500 }
  0xbe   : > { %v552_v55 = vpop.permute.xlu0 %551 }
  0xbf   : > { %v557_v53 = vpop.permute.xlu1 %556 }
  0xc2   : > { %v506_v5 = vpop.permute.xlu0 %505 }
  0xc3   : > { %v511_v1 = vpop.permute.xlu1 %510 }
  0xc6   : > { %v562_v21 = vpop.permute.xlu0 %561 }
  0xc7   : > { %v567_v18 = vpop.permute.xlu1 %566 }
  0xca   : > { %v590_v29 = vpop.permute.xlu0 %589 }
 0x10e   : > { %v819_v50 = vpop.f32.mrb[0].mxu0 }
 0x10f   : > { %v514_v51 = vmul.f32 %v819_v50, %v481_v43  ;;  %v426_v52 = vpop.f32.mrb[1].mxu0 }
 0x110   : > { %v513_v54 = vmul.f32 %v476_v41, %v426_v52 }
 0x111   : > { %v570_v56 = vadd.f32 %v537_v42, %v514_v51 }
 0x112   : > { %v569_v57 = vadd.f32 %v532_v40, %v513_v54  ;;  %v822_v58 = vpop.f32.mrb[2].mxu0 }
 0x113   : > { %v578_v59 = vmax.f32 %v570_v56, 0.0  ;;  %v516_v60 = vmul.f32 %v822_v58, %v491_v44  ;;  %v436_v61 = vpop.f32.mrb[3].mxu0 }
 0x114   : > { %v577_v62 = vmax.f32 %v569_v57, 0.0  ;;  %v515_v63 = vmul.f32 %v486_v45, %v436_v61 }
 0x115   : > { %v572_v0 = vadd.f32 %v547_v46, %v516_v60 }
 0x116   : > { %v571_v2 = vadd.f32 %v542_v47, %v515_v63  ;;  %v825_v3 = vpop.f32.mrb[4].mxu0  ;;  %v857_v4 = vpack.c.bf16 %v578_v59, %v577_v62 }
 0x117   : > { %v580_v6 = vmax.f32 %v572_v0, 0.0  ;;  %v518_v7 = vmul.f32 %v825_v3, %v501_v48  ;;  %v446_v8 = vpop.f32.mrb[5].mxu0 }
 0x118   : > { %v579_v9 = vmax.f32 %v571_v2, 0.0  ;;  %v517_v10 = vmul.f32 %v496_v49, %v446_v8  ;;  %858 = vmatpush3.bf16.msra.mxu1 %v857_v4 }
 0x119   : > { %v574_v11 = vadd.f32 %v557_v53, %v518_v7  ;;  %859 = vmatprep.subr.bf16.mxu1 %v1045_v38 }
 0x11a   : > { %v573_v12 = vadd.f32 %v552_v55, %v517_v10  ;;  %v828_v13 = vpop.f32.mrb[6].mxu0  ;;  %v860_v14 = vpack.c.bf16 %v580_v6, %v579_v9 }
 0x11b   : > { %v582_v15 = vmax.f32 %v574_v11, 0.0  ;;  %v520_v16 = vmul.f32 %v828_v13, %v511_v1  ;;  %v456_v17 = vpop.f32.mrb[7].mxu0 }
 0x11c   : > { %v581_v19 = vmax.f32 %v573_v12, 0.0  ;;  %v519_v20 = vmul.f32 %v506_v5, %v456_v17  ;;  %861 = vmatpush3.bf16.msra.mxu1 %v860_v14 }
 0x11d   : > { %v576_v22 = vadd.f32 %v567_v18, %v520_v16  ;;  %862 = vmatprep.subr.bf16.mxu1 %v1045_v38 }
 0x11e   : > { %v575_v23 = vadd.f32 %v562_v21, %v519_v20  ;;  %v863_v24 = vpack.c.bf16 %v582_v15, %v581_v19 }
 0x11f   : > { %v584_v25 = vmax.f32 %v576_v22, 0.0 }
 0x120   : > { %v583_v26 = vmax.f32 %v575_v23, 0.0  ;;  %864 = vmatpush3.bf16.msra.mxu1 %v863_v24 }
 0x121   : > { %865 = vmatprep.subr.bf16.mxu1 %v1045_v38 }
 0x122   : > { %v866_v27 = vpack.c.bf16 %v584_v25, %v583_v26 }
 0x124   : > { %867 = vmatpush3.bf16.msra.mxu1 %v866_v27 }
 0x127   : > { %846 = vmatmul.mubr.msk.f32.vlgmr.msra.gmra.mrb[0].mxu1 %vm592_vm3, %v585_v28 }
 0x1fa   : > { %v662_v30 = vpop.f32.mrb[0].mxu1 }
 0x1fb   : > { %v663_v31 = vadd.f32 %v662_v30, %v590_v29  ;;  %v847_v32 = vpop.f32.mrb[1].mxu1 }
 0x1fd   : > { %666 = vst [vmem:[%s317_s13] sm:$0xff] %v663_v31 }
 0x1fe   : > { %961 = shalt.err (!%p958_p7)
}
 0x1ff   : > { %s962_s10 = scalar_lea.hbm %s1265_s0, 128  ;;  %s966_s9 = scalar_lea.hbm %s1325_s6, 512 }
 0x200   : > { %p963_p10 = scmp.ne.s32.totalorder %s1265_s0, %s962_s10  ;;  %p967_p13 = scmp.lt.u32.totalorder %s1265_s0, %s1325_s6 }
 0x201   : > { %p968_p0 = scmp.lt.u32.totalorder %s966_s9, %s962_s10  ;;  %p970_p2 = scmp.lt.u32.totalorder %s962_s10, %s1265_s0 }
 0x202   : > { %p964_p11 = pnand %p963_p10, %p1144_p8 }
 0x203   : > { %p969_p1 = por %p968_p0, %p967_p13 }
 0x204   : > { %p965_p12 = pneg %p964_p11 }
 0x205   : > { %p971_p3 = por %p970_p2, %p969_p1 }
 0x207   : > { %p972_p4 = pnand %p971_p3, %p965_p12 }
 0x209   : > { %975 = shalt.err (!%p972_p4)
}
 0x20a   : > { %871 = dma.vmem_to_hbm [thread:$0]  (%p1144_p8), %s1267_s15, 128, %s1265_s0, %s668_s25  }
 0x20b PF: > { %p877_p5 = scmp.ge.s32.totalorder %s1042_s28, 2  ;;  %s695_s19 = sand.u32 1, %s1014_s21  }
 0x20c   : > { %s696_s24 = scalar_lea.sflag [#allocation4], %s695_s19 }
 0x20d   : > { %p874_p6 = pnand %p877_p5, %p1148_p9 }
 0x20f   : > { %1009 = dma.done.wait (!%p874_p6), %s696_s24, 128  }
 0x210   : > { %1011 = vsyncadd (!%p874_p6), %s696_s24, 4294967168  ;;  %s19_s28 = sadd.s32 1, %s1042_s28   ;;  %s1331_s21 = smov %s1018_s22 }
 0x211   : > { %p16_p7 = scmp.ge.s32.totalorder %s19_s28, 6   ;;  %s1332_s22 = smov %s1022_s23 }
 0x212   : > { %s1333_s23 = smov %s1156_s16  ;;  %s1334_s24 = smov %s1034_s26 }
 0x213   : > { %s1335_s25 = smov %s1038_s27  ;;  %s1336_s26 = smov %s1339_s7 }
 0x214   : > { %s1337_s27 = smov %s1343_s8  ;;  %18 = sbr.rel (!%p16_p7) target bundleno = 7 (0x7), region = 122 }
 0x21b   :  { %701 = vsyncpa [#allocation4], 1 }
 0x21c   :  { %703 = vsyncpa [#allocation4 + $0x1], 1 }

</bundles_post_ra>
